<compile_context>
chip_gen: v5e
topology: v5e:2x2
jax: 0.10.0
libtpu: 0.0.40
codegen_flags: <defaults>
</compile_context>

<pallas_src>
import jax
import jax.numpy as jnp
from jax.experimental import pallas as pl
from jax.experimental.pallas import tpu as pltpu


def _cdiv(a, b):
    return -(-a // b)


def _round_up(a, b):
    return _cdiv(a, b) * b


def _make_resblock_kernel(cin_p, cout_p, k, wp, tm):
    # Flat-pixel shift of tap (ky, kx) in the padded (Hp, Wp) grid.
    shifts = [ky * wp + kx for ky in range(k) for kx in range(k)]

    def kernel(xc_ref, xh_ref, wcatT_ref, bcat_ref, w2T_ref, b2_ref, o_ref):
        # xc: (1, Cin_p, TM) center pixel tile (bf16)
        # xh: (1, Cin_p, HALO_BLOCK) right halo tile (bf16)
        xw = jnp.concatenate([xc_ref[0], xh_ref[0]], axis=1)   # (Cin_p, TM+HB)

        # In-VMEM im2col: K*K lane-shifted views stacked along sublanes.
        # Static unaligned lane slices lower to XLU rotates, overlapping MXU.
        lhsT = jnp.concatenate([xw[:, s:s + tm] for s in shifts], axis=0)

        # One wide MXU matmul computes conv1 (3x3) AND the shortcut branch
        # (shortcut weights live on the center-tap rows of wcatT).
        both = jnp.dot(wcatT_ref[...], lhsT,
                       preferred_element_type=jnp.float32)      # (2*Cout_p, TM) f32
        both = both + bcat_ref[...]                             # + (2*Cout_p, 1)

        h = jnp.maximum(both[:cout_p, :], 0.0)                  # conv1+b1 -> ReLU
        sc = both[cout_p:, :]                                   # shortcut + bs

        left = jnp.dot(w2T_ref[...], h.astype(w2T_ref.dtype),   # 1x1 conv, bf16 ops
                       preferred_element_type=jnp.float32) + b2_ref[...]
        o_ref[0] = jnp.maximum(left + sc, 0.0).astype(o_ref.dtype)

    return kernel


def _pick_tm(n, hpwp, halo_block, step_bytes, vmem_budget=20 * 2 ** 20):
    """Largest lane-dense tile (multiple of halo_block, within VMEM budget)
    that still yields >= 4 grid steps (>= 2 pipeline steps per TensorCore)."""
    cands = [tm for tm in (2048, 1024, 512, 256, 128)
             if tm % halo_block == 0 and step_bytes(tm) <= vmem_budget]
    if not cands:
        cands = [max(128, halo_block)]
    for tm in cands:                      # largest first
        if n * _cdiv(hpwp, tm) >= 4:
            return tm
    return cands[-1]                      # tiny problem: smallest lane-dense tile


def residual_block_forward(x_nchw, params, kernel_size=3):
    """x_nchw: (N, Cin, H, W).  params: PyTorch-shaped (OIHW) conv weights/biases."""
    w1, b1, w2, b2, ws, bs = params
    N, Cin, H, W = x_nchw.shape
    Cout = w1.shape[0]
    K = kernel_size
    P = (K - 1) // 2
    Hp, Wp = H + 2 * P, W + 2 * P
    HpWp = Hp * Wp

    # Channel padding keeps bf16 sublane tiles and f32 slice boundaries aligned.
    cin_p = _round_up(Cin, 16)
    cout_p = _round_up(Cout, 16)
    kkc_p = K * K * cin_p

    # Largest in-tile tap shift, rounded to a lane-dense halo block.
    halo = (K - 1) * Wp + (K - 1)
    halo_block = 128
    while halo_block < halo:
        halo_block *= 2

    def step_bytes(tm):
        return int(1.5 * (2 * cin_p * (tm + halo_block) * 2      # x tiles (bf16, dbl-buf)
                          + 2 * cout_p * tm * 4                   # out tile (f32, dbl-buf)
                          + kkc_p * tm * 2                        # in-VMEM im2col
                          + 3 * cout_p * tm * 4                   # f32 temporaries
                          + 2 * cout_p * kkc_p * 2                # fused weights
                          + cout_p * cout_p * 2 + 3 * cout_p * 4))

    TM = _pick_tm(N, HpWp, halo_block, step_bytes)
    T = _cdiv(HpWp, TM)               # pixel tiles per image
    m_per = T * TM                    # padded pixels per image (tail is garbage)
    l_pad = m_per + halo_block        # + room for the last tile's halo
    hb_per_tm = TM // halo_block

    # ---- input: (N, Cin_p, l_pad) bf16, zero padded.  No transpose, no im2col. ----
    xp = jnp.pad(x_nchw, ((0, 0), (0, cin_p - Cin), (P, P), (P, P)))
    x_flat = jnp.pad(xp.reshape(N, cin_p, HpWp),
                     ((0, 0), (0, 0), (0, l_pad - HpWp))).astype(jnp.bfloat16)

    # ---- fused weights: [conv1 3x3 ; shortcut 1x1-or-identity] ----
    w1t = jnp.transpose(w1, (2, 3, 1, 0)).reshape(K * K, Cin, Cout)   # [tap, ci, co]
    w1t = jnp.pad(w1t, ((0, 0), (0, cin_p - Cin), (0, cout_p - Cout)))
    if Cin != Cout:
        ws_blk = jnp.transpose(ws[:, :, 0, 0], (1, 0))                # (Cin, Cout)
        bs_vec = bs
    else:
        ws_blk = jnp.eye(Cin, dtype=x_nchw.dtype)                     # identity shortcut
        bs_vec = jnp.zeros((Cout,), x_nchw.dtype)
    ws_blk = jnp.pad(ws_blk, ((0, cin_p - Cin), (0, cout_p - Cout)))
    center = (K // 2) * K + (K // 2)
    ws_t = jnp.zeros((K * K, cin_p, cout_p), ws_blk.dtype).at[center].set(ws_blk)

    wcat = jnp.concatenate([w1t, ws_t], axis=2).reshape(kkc_p, 2 * cout_p)
    wcatT = wcat.T.astype(jnp.bfloat16)                               # (2*Cout_p, KKC_p)
    bcat = jnp.concatenate([jnp.pad(b1, (0, cout_p - Cout)),
                            jnp.pad(bs_vec, (0, cout_p - Cout))]
                           ).astype(jnp.float32).reshape(2 * cout_p, 1)
    w2T = jnp.pad(w2[:, :, 0, 0], ((0, cout_p - Cout), (0, cout_p - Cout))
                  ).astype(jnp.bfloat16)                              # (Cout_p, Cout_p)
    b2c = jnp.pad(b2, (0, cout_p - Cout)).astype(jnp.float32).reshape(cout_p, 1)

    out_flat = pl.pallas_call(
        _make_resblock_kernel(cin_p, cout_p, K, Wp, TM),
        out_shape=jax.ShapeDtypeStruct((N, cout_p, m_per), jnp.float32),
        grid=(N, T),
        in_specs=[
            pl.BlockSpec((1, cin_p, TM), lambda n, i: (n, 0, i)),            # center
            pl.BlockSpec((1, cin_p, halo_block),
                         lambda n, i: (n, 0, (i + 1) * hb_per_tm)),          # right halo
            pl.BlockSpec((2 * cout_p, kkc_p), lambda n, i: (0, 0)),          # fused W
            pl.BlockSpec((2 * cout_p, 1), lambda n, i: (0, 0)),              # fused b
            pl.BlockSpec((cout_p, cout_p), lambda n, i: (0, 0)),             # w2 (1x1)
            pl.BlockSpec((cout_p, 1), lambda n, i: (0, 0)),                  # b2
        ],
        out_specs=pl.BlockSpec((1, cout_p, TM), lambda n, i: (n, 0, i)),
        compiler_params=pltpu.CompilerParams(
            dimension_semantics=("parallel", "parallel"),
            vmem_limit_bytes=int(min(max(2 * step_bytes(TM), 32 * 2 ** 20),
                                     64 * 2 ** 20))),
    )(x_flat, x_flat, wcatT, bcat, w2T, b2c)

    # Already N-major: just crop padded channels / padded-grid pixels (no transpose).
    out = out_flat[:, :Cout, :HpWp].reshape(N, Cout, Hp, Wp)[:, :, :H, :W]
    return out


def reference_forward(x, w1, b1, w2, b2, ws, bs, K):
    """Pure-JAX NCHW reference (mirrors the PyTorch module, f32)."""
    def conv(x, w, b, pad):
        o = jax.lax.conv_general_dilated(
            x, w, window_strides=(1, 1), padding=[(pad, pad), (pad, pad)],
            dimension_numbers=('NCHW', 'OIHW', 'NCHW'))
        return o + b[None, :, None, None]

    h = jax.nn.relu(conv(x, w1, b1, (K - 1) // 2))
    left = conv(h, w2, b2, 0)
    sc = conv(x, ws, bs, 0)
    return jax.nn.relu(left + sc)


if __name__ == "__main__":
    # Small shapes consistent with the module: N=2, Cin=4, Cout=8, H=W=16.
    N, Cin, Cout, H, W, K = 2, 4, 8, 16, 16, 3

    key = jax.random.PRNGKey(0)
    kx, k1, k2, k3, k4, k5, k6 = jax.random.split(key, 7)

    x = jax.random.normal(kx, (N, Cin, H, W), jnp.float32)

    # Deterministic synthetic parameters (PyTorch conv shapes: OIHW).
    w1 = 0.2 * jax.random.normal(k1, (Cout, Cin, K, K), jnp.float32)
    b1 = 0.1 * jax.random.normal(k2, (Cout,), jnp.float32)
    w2 = 0.2 * jax.random.normal(k3, (Cout, Cout, 1, 1), jnp.float32)
    b2 = 0.1 * jax.random.normal(k4, (Cout,), jnp.float32)
    ws = 0.2 * jax.random.normal(k5, (Cout, Cin, 1, 1), jnp.float32)
    bs = 0.1 * jax.random.normal(k6, (Cout,), jnp.float32)

    params = (w1, b1, w2, b2, ws, bs)

    out = residual_block_forward(x, params, kernel_size=K)
    out = jax.block_until_ready(out)

    ref = reference_forward(x, w1, b1, w2, b2, ws, bs, K)
    assert out.shape == (N, Cout, H, W)
    # bf16 matmul operands (f32 accumulation) -> looser tolerance than pure f32.
    assert jnp.allclose(out, ref, rtol=5e-2, atol=5e-2), \
        float(jnp.max(jnp.abs(out - ref)))

    print("KERNEL_OK")
</pallas_src>

<mosaic_0001>
module attributes {stable_mosaic.version = 11 : i64} {
  func.func @kernel(%arg0: i32, %arg1: i32, %arg2: memref<1x16x256xbf16, #tpu.memory_space<vmem>>, %arg3: memref<1x16x128xbf16, #tpu.memory_space<vmem>>, %arg4: memref<32x144xbf16, #tpu.memory_space<vmem>>, %arg5: memref<32x1xf32, #tpu.memory_space<vmem>>, %arg6: memref<16x16xbf16, #tpu.memory_space<vmem>>, %arg7: memref<16x1xf32, #tpu.memory_space<vmem>>, %arg8: memref<1x16x256xf32, #tpu.memory_space<vmem>>) attributes {dimension_semantics = [#tpu.dimension_semantics<parallel>, #tpu.dimension_semantics<parallel>], iteration_bounds = array<i64: 2, 2>, scalar_prefetch = 0 : i64, scratch_operands = 0 : i64, tpu.core_type = #tpu.core_type<tc>, window_params = [{transform_indices = @transform_0, window_bounds = array<i64: 1, 16, 256>}, {transform_indices = @transform_1, window_bounds = array<i64: 1, 16, 128>}, {pipeline_mode = #tpu.pipeline_mode<synchronous>, transform_indices = @transform_2, window_bounds = array<i64: 32, 144>}, {pipeline_mode = #tpu.pipeline_mode<synchronous>, transform_indices = @transform_3, window_bounds = array<i64: 32, 1>}, {pipeline_mode = #tpu.pipeline_mode<synchronous>, transform_indices = @transform_4, window_bounds = array<i64: 16, 16>}, {pipeline_mode = #tpu.pipeline_mode<synchronous>, transform_indices = @transform_5, window_bounds = array<i64: 16, 1>}, {transform_indices = @transform_6, window_bounds = array<i64: 1, 16, 256>}]} {
    %c0 = arith.constant 0 : index
    %c0_0 = arith.constant 0 : index
    %c0_1 = arith.constant 0 : index
    %0 = vector.load %arg2[%c0, %c0_0, %c0_1] : memref<1x16x256xbf16, #tpu.memory_space<vmem>>, vector<1x16x256xbf16>
    %1 = vector.shape_cast %0 : vector<1x16x256xbf16> to vector<16x256xbf16>
    %c0_2 = arith.constant 0 : index
    %c0_3 = arith.constant 0 : index
    %c0_4 = arith.constant 0 : index
    %2 = vector.load %arg3[%c0_2, %c0_3, %c0_4] : memref<1x16x128xbf16, #tpu.memory_space<vmem>>, vector<1x16x128xbf16>
    %3 = vector.shape_cast %2 : vector<1x16x128xbf16> to vector<16x128xbf16>
    %4 = tpu.concatenate %1, %3 in 1 : vector<16x256xbf16>, vector<16x128xbf16> -> vector<16x384xbf16>
    %5 = vector.extract_strided_slice %4 {offsets = [0, 0], sizes = [16, 256], strides = [1, 1]} : vector<16x384xbf16> to vector<16x256xbf16>
    %6 = vector.extract_strided_slice %4 {offsets = [0, 1], sizes = [16, 256], strides = [1, 1]} : vector<16x384xbf16> to vector<16x256xbf16>
    %7 = vector.extract_strided_slice %4 {offsets = [0, 2], sizes = [16, 256], strides = [1, 1]} : vector<16x384xbf16> to vector<16x256xbf16>
    %8 = vector.extract_strided_slice %4 {offsets = [0, 18], sizes = [16, 256], strides = [1, 1]} : vector<16x384xbf16> to vector<16x256xbf16>
    %9 = vector.extract_strided_slice %4 {offsets = [0, 19], sizes = [16, 256], strides = [1, 1]} : vector<16x384xbf16> to vector<16x256xbf16>
    %10 = vector.extract_strided_slice %4 {offsets = [0, 20], sizes = [16, 256], strides = [1, 1]} : vector<16x384xbf16> to vector<16x256xbf16>
    %11 = vector.extract_strided_slice %4 {offsets = [0, 36], sizes = [16, 256], strides = [1, 1]} : vector<16x384xbf16> to vector<16x256xbf16>
    %12 = vector.extract_strided_slice %4 {offsets = [0, 37], sizes = [16, 256], strides = [1, 1]} : vector<16x384xbf16> to vector<16x256xbf16>
    %13 = vector.extract_strided_slice %4 {offsets = [0, 38], sizes = [16, 256], strides = [1, 1]} : vector<16x384xbf16> to vector<16x256xbf16>
    %14 = tpu.concatenate %5, %6, %7, %8, %9, %10, %11, %12, %13 in 0 : vector<16x256xbf16>, vector<16x256xbf16>, vector<16x256xbf16>, vector<16x256xbf16>, vector<16x256xbf16>, vector<16x256xbf16>, vector<16x256xbf16>, vector<16x256xbf16>, vector<16x256xbf16> -> vector<144x256xbf16>
    %c0_5 = arith.constant 0 : index
    %c0_6 = arith.constant 0 : index
    %15 = vector.load %arg4[%c0_5, %c0_6] : memref<32x144xbf16, #tpu.memory_space<vmem>>, vector<32x144xbf16>
    %cst = arith.constant dense<0.000000e+00> : vector<32x256xf32>
    %16 = tpu.matmul %15, %14, %cst {dimension_numbers = #tpu.dot_dimension_numbers<[1], [0], [0], [1], [0, 0, 1, 1], [], []>} : vector<32x144xbf16>, vector<144x256xbf16>, vector<32x256xf32> -> vector<32x256xf32>
    %c0_7 = arith.constant 0 : index
    %c0_8 = arith.constant 0 : index
    %17 = vector.load %arg5[%c0_7, %c0_8] : memref<32x1xf32, #tpu.memory_space<vmem>>, vector<32x1xf32>
    %18 = vector.broadcast %17 : vector<32x1xf32> to vector<32x256xf32>
    %19 = arith.addf %16, %18 : vector<32x256xf32>
    %20 = vector.extract_strided_slice %19 {offsets = [0, 0], sizes = [16, 256], strides = [1, 1]} : vector<32x256xf32> to vector<16x256xf32>
    %cst_9 = arith.constant 0.000000e+00 : f32
    %21 = vector.broadcast %cst_9 : f32 to vector<16x256xf32>
    %22 = arith.maximumf %20, %21 : vector<16x256xf32>
    %23 = vector.extract_strided_slice %19 {offsets = [16, 0], sizes = [16, 256], strides = [1, 1]} : vector<32x256xf32> to vector<16x256xf32>
    %c0_10 = arith.constant 0 : index
    %c0_11 = arith.constant 0 : index
    %24 = vector.load %arg6[%c0_10, %c0_11] : memref<16x16xbf16, #tpu.memory_space<vmem>>, vector<16x16xbf16>
    %25 = arith.truncf %22 : vector<16x256xf32> to vector<16x256xbf16>
    %cst_12 = arith.constant dense<0.000000e+00> : vector<16x256xf32>
    %26 = tpu.matmul %24, %25, %cst_12 {dimension_numbers = #tpu.dot_dimension_numbers<[1], [0], [0], [1], [0, 0, 1, 1], [], []>} : vector<16x16xbf16>, vector<16x256xbf16>, vector<16x256xf32> -> vector<16x256xf32>
    %c0_13 = arith.constant 0 : index
    %c0_14 = arith.constant 0 : index
    %27 = vector.load %arg7[%c0_13, %c0_14] : memref<16x1xf32, #tpu.memory_space<vmem>>, vector<16x1xf32>
    %28 = vector.broadcast %27 : vector<16x1xf32> to vector<16x256xf32>
    %29 = arith.addf %26, %28 : vector<16x256xf32>
    %30 = arith.addf %29, %23 : vector<16x256xf32>
    %cst_15 = arith.constant 0.000000e+00 : f32
    %31 = vector.broadcast %cst_15 : f32 to vector<16x256xf32>
    %32 = arith.maximumf %30, %31 : vector<16x256xf32>
    %c0_16 = arith.constant 0 : index
    %c0_17 = arith.constant 0 : index
    %c0_18 = arith.constant 0 : index
    %33 = vector.load %arg8[%c0_16, %c0_17, %c0_18] : memref<1x16x256xf32, #tpu.memory_space<vmem>>, vector<1x16x256xf32>
    %34 = vector.shape_cast %33 : vector<1x16x256xf32> to vector<16x256xf32>
    %35 = vector.shape_cast %32 : vector<16x256xf32> to vector<1x16x256xf32>
    tpu.vector_store %arg8[%c0_16, %c0_17, %c0_18], %35 {strides = array<i32>} : memref<1x16x256xf32, #tpu.memory_space<vmem>>, vector<1x16x256xf32>,
    return
  }
  func.func @transform_0(%arg0: i32, %arg1: i32) -> (i32, i32, i32) {
    %c0_i32 = arith.constant 0 : i32
    %c0_i32_0 = arith.constant 0 : i32
    return %arg0, %c0_i32, %arg1 : i32, i32, i32
  }
  func.func @transform_1(%arg0: i32, %arg1: i32) -> (i32, i32, i32) {
    %c1_i32 = arith.constant 1 : i32
    %0 = arith.addi %arg1, %c1_i32 : i32
    %c2_i32 = arith.constant 2 : i32
    %1 = arith.muli %0, %c2_i32 : i32
    %c0_i32 = arith.constant 0 : i32
    %c0_i32_0 = arith.constant 0 : i32
    return %arg0, %c0_i32, %1 : i32, i32, i32
  }
  func.func @transform_2(%arg0: i32, %arg1: i32) -> (i32, i32) {
    %c0_i32 = arith.constant 0 : i32
    %c0_i32_0 = arith.constant 0 : i32
    %c0_i32_1 = arith.constant 0 : i32
    return %c0_i32, %c0_i32_0 : i32, i32
  }
  func.func @transform_3(%arg0: i32, %arg1: i32) -> (i32, i32) {
    %c0_i32 = arith.constant 0 : i32
    %c0_i32_0 = arith.constant 0 : i32
    %c0_i32_1 = arith.constant 0 : i32
    return %c0_i32, %c0_i32_0 : i32, i32
  }
  func.func @transform_4(%arg0: i32, %arg1: i32) -> (i32, i32) {
    %c0_i32 = arith.constant 0 : i32
    %c0_i32_0 = arith.constant 0 : i32
    %c0_i32_1 = arith.constant 0 : i32
    return %c0_i32, %c0_i32_0 : i32, i32
  }
  func.func @transform_5(%arg0: i32, %arg1: i32) -> (i32, i32) {
    %c0_i32 = arith.constant 0 : i32
    %c0_i32_0 = arith.constant 0 : i32
    %c0_i32_1 = arith.constant 0 : i32
    return %c0_i32, %c0_i32_0 : i32, i32
  }
  func.func @transform_6(%arg0: i32, %arg1: i32) -> (i32, i32, i32) {
    %c0_i32 = arith.constant 0 : i32
    %c0_i32_0 = arith.constant 0 : i32
    return %arg0, %c0_i32, %arg1 : i32, i32, i32
  }
}

</mosaic_0001>

<bundles_post_ra>
// kernel: tpu_custom_call.1
= control target key start
LH: loop header
LB: loop body
LE: loop exit
PB: predicated region body
PF: predicated region fallthrough
CT: control target
= control target key end

     0   :  { %s1569_s0 = inlined_call_operand.hbm [shape: bf16[2,16,640], index: 0, kind: input, shape index: {}]   ;;  %s1570_s1 = inlined_call_operand.hbm [shape: bf16[2,16,640], index: 1, kind: input, shape index: {}]   ;;  %s1571_s2 = inlined_call_operand.vmem [shape: bf16[32,144], index: 2, kind: input, shape index: {}]   ;;  %s1572_s3 = inlined_call_operand.vmem [shape: f32[32,1], index: 3, kind: input, shape index: {}]   ;;  %s1573_s4 = inlined_call_operand.vmem [shape: bf16[16,16], index: 4, kind: input, shape index: {}]   ;;  %s1574_s5 = inlined_call_operand.vmem [shape: f32[16,1], index: 5, kind: input, shape index: {}]   ;;  %s1575_s6 = inlined_call_operand.hbm [shape: f32[2,16,512], index: 6, kind: output, shape index: {}]  }
   0x1   :  { %1586 = sst [smem:[#allocation22_spill]] %s1569_s0 }
   0x2   :  { %1587 = sst [smem:[#allocation23_spill]] %s1573_s4 }
   0x3   :  { %1588 = sst [smem:[#allocation24_spill]] %s1575_s6 }
   0x4   :  { %11 = vsyncpa [#allocation3], 0 }
   0x5   :  { %13 = vsyncpa [#allocation3 + $0x1], 0 }
   0x6   :  { %14 = vsyncpa [#allocation6], 0 }
   0x7   :  { %16 = vsyncpa [#allocation6 + $0x1], 0 }
   0x8   :  { %17 = vsyncpa [#allocation4], 0 }
   0x9   :  { %19 = vsyncpa [#allocation4 + $0x1], 0  ;;  %s1246_s21 = smov 0   ;;  %s1248_s22 = smov 0  }
   0xa   :  { %s1250_s23 = smov 0   ;;  %s1252_s24 = smov 0  }
   0xb   :  { %s1254_s25 = smov 0   ;;  %s1256_s26 = smov 0  }
   0xc   :  { %s1258_s27 = smov 0   ;;  %s1260_s28 = smov 0  }
   0xd   :  { %s1262_s29 = smov 0   ;;  %s1264_s30 = smov 0  }
   0xe   :  { %s1266_s7 = smov 0  }
   0xf LB: > { %1589 = sst [smem:[#allocation11_spill]] %s1162_s24  ;;  %s1576_s8 = sadd.s32 4294967295, %s1190_s7   ;;  %s1190_s7 = sphi %s1266_s7, %s25_s7   ;;  %s1186_s30 = sphi %s1264_s30, %s1629_s30   ;;  %s1182_s29 = sphi %s1262_s29, %s1621_s29   ;;  %s1178_s28 = sphi %s1260_s28, %s1628_s28   ;;  %s1174_s27 = sphi %s1258_s27, %s1620_s27   ;;  %s1170_s26 = sphi %s1256_s26, %s1619_s26   ;;  %s1166_s25 = sphi %s1254_s25, %s1627_s25   ;;  %s1162_s24 = sphi %s1252_s24, %s1626_s24   ;;  %s1158_s23 = sphi %s1250_s23, %s1625_s23   ;;  %s1154_s22 = sphi %s1248_s22, %s1624_s22   ;;  %s1150_s21 = sphi %s1246_s21, %s1623_s21  }
  0x10   : > { %1590 = sst [smem:[#allocation12_spill]] %s1170_s26  ;;  %s34_s10 = sadd.s32 1, %s1182_s29 }
  0x11   : > { %1591 = sst [smem:[#allocation13_spill]] %s1174_s27  ;;  %s37_s11 = sadd.s32 1, %s1186_s30 }
  0x12   : > { %1592 = sst [smem:[#allocation14_spill]] %s1178_s28  ;;  %p35_p0 = scmp.ge.s32.totalorder %s34_s10, 2 }
  0x13   : > { %1593 = sst [smem:[#allocation15_spill]] %s1182_s29  ;;  %s46_s12 = sadd.s32 1, %s1170_s26 }
  0x14   : > { %p53_p1 = scmp.ne.s32.totalorder %s1170_s26, %s1166_s25  ;;  %p54_p2 = scmp.eq.s32.totalorder %s1190_s7, 0 }
  0x15   : > { %s1631_s10 = smov (%p35_p0, %s34_s10), 0  ;;  %s1633_s11 = smov (!%p35_p0, %s37_s11), %s1186_s30 }
  0x16   : > { %1594 = sst [smem:[#allocation16_spill]] %s1631_s10  ;;  %s42_s13 = ssub.s32 %s1182_s29, %s1631_s10 }
  0x17   : > { %p1319_p3 = por %p54_p2, %p53_p1  ;;  %p39_p4 = scmp.ge.s32.totalorder %s1633_s11, 2 }
  0x18   : > { %p59_p5 = scmp.ne.s32.totalorder %s1166_s25, %s1162_s24  ;;  %p1327_p6 = scmp.eq.s32.totalorder %s1576_s8, 0 }
  0x19   : > { %s1332_s16 = sshll.u32 %s1182_s29, 1  ;;  %s1635_s11 = smov (%p39_p4, %s1633_s11), 0 }
  0x1a   : > { %1597 = sst [smem:[#allocation17_spill]] %s1635_s11  ;;  %p1341_p7 = por %p1327_p6, %p59_p5 }
  0x1b   : > { %s863_s18 = sadd.s32 2, %s1332_s16  ;;  %s41_s19 = ssub.s32 %s1186_s30, %s1635_s11 }
  0x1c   : > { %s864_s20 = sshll.u32 %s1631_s10, 1  ;;  %s43_s9 = sor.u32 %s42_s13, %s41_s19 }
  0x1d   : > { %s865_s8 = sadd.s32 2, %s864_s20  ;;  %p44_p8 = scmp.eq.s32.totalorder %s43_s9, 0 }
  0x1e   : > { %s74_s29 = ssub.s32 %s863_s18, %s865_s8  ;;  %s78_s28 = sadd.s32 1, %s1158_s23 }
  0x1f   : > { %s75_s6 = sor.u32 %s74_s29, %s41_s19  ;;  %p85_p10 = scmp.ne.s32.totalorder %s1158_s23, %s1154_s22 }
  0x20   : > { %s1351_s27 = scalar_select %p44_p8, %s1170_s26, %s46_s12  }
  0x21   : > { %p76_p9 = scmp.eq.s32.totalorder %s75_s6, 0  ;;  %p91_p11 = scmp.ne.s32.totalorder %s1154_s22, %s1150_s21 }
  0x22   : > { %1599 = sst [smem:[#allocation18_spill]] %s1351_s27  ;;  %s1600_s4 = sadd.s32 4294967295, %s1190_s7  }
  0x23   : > { %p201_p12 = scmp.eq.s32.totalorder %s1600_s4, 3  ;;  %p1364_p13 = por %p85_p10, %p54_p2 }
  0x24   : > { %s1360_s11 = scalar_select %p76_p9, %s1158_s23, %s78_s28  }
  0x25   : > { %p1370_p0 = por %p91_p11, %p1327_p6  ;;  %p1377_p4 = por %p201_p12, %p53_p1 }
  0x26   : > { %1601 = sst [smem:[#allocation19_spill]] %s1360_s11  ;;  %s1606_s6 = sadd.s32 4294967294, %s1190_s7  }
  0x27   : > { %s1604_s29 = scalar_select %p1377_p4, 1, 0 }
  0x28   : > { %p207_p8 = scmp.eq.s32.totalorder %s1606_s6, 3  ;;  %p802_p2 = scmp.ge.s32.totalorder %s1190_s7, 4 }
  0x29   : > { %1605 = sst [smem:[#allocation20_spill]] %s1604_s29 }
  0x2a   : > { %p1386_p9 = por %p207_p8, %p59_p5  ;;  %235 = sbr.rel (%p802_p2) target bundleno = 83 (0x53), region = 32 }
  0x2c   : > { %s1607_s4 = scalar_select %p1386_p9, 1, 0 }
  0x2e   : > { %1608 = sst [smem:[#allocation21_spill]] %s1607_s4 }
  0x2f   : > { %238 = sbr.rel (!%p1319_p3) target bundleno = 75 (0x4b), region = 36  ;;  %s239_s21 = sand.u32 (%p1319_p3), 1, %s1170_s26  }
  0x30   : > { %s803_s28 = sshll.u32 (%p1319_p3), %s239_s21, 4  ;;  %s1394_s8 = scalar_lea.sflag (%p1319_p3), [#allocation3], %s239_s21 }
  0x31   : > { %s243_s12 = scalar_lea.vmem (%p1319_p3), [#allocation2], %s803_s28  ;;  %s876_s13 = smul.u32 (%p1319_p3), 10, %s1186_s30 }
  0x32   : > { %s1397_s15 = sshll.u32 (%p1319_p3), %s243_s12, 4  ;;  %s1609_s0 = sld [smem:[#allocation22_spill]] (%p1319_p3)  ;;  %s262_s15 = int_to_ptr.vmem [resolvable:$true] %s1397_s15 }
  0x33   : > { %s254_s18 = sadd.s32 (%p1319_p3), %s876_s13, %s1332_s16 }
  0x34   : > { %s807_s19 = sshll.u32 %s254_s18, 2 }
  0x38   : > { %s256_s14 = scalar_lea.hbm %s1609_s0, %s807_s19  ;;  %s1006_s28 = scalar_lea.hbm %s1609_s0, 80 }
  0x39   : > { %s259_s27 = sshll.u32 %s256_s14, 4  ;;  %s260_s27 = int_to_ptr.hbm [resolvable:$true] %s259_s27 }
  0x3a   : > { %s995_s11 = sshra.s32 %s260_s27, 4  ;;  %s996_s11 = int_to_ptr.hbm [resolvable:$true] %s995_s11 }
  0x3b   : > { %s1002_s26 = scalar_lea.hbm %s996_s11, 16 }
  0x3c   : > { %p1003_p1 = scmp.ne.s32.totalorder %s996_s11, %s1002_s26  ;;  %p1008_p3 = scmp.lt.s32.totalorder %s1006_s28, %s1002_s26 }
  0x3e   : > { %p1010_p5 = pnand %p1008_p3, %p1003_p1 }
  0x40   : > { %1013 = shalt.err (!%p1010_p5)
}
  0x41   : > { %s1014_s12 = sshra.s32 %s262_s15, 4  ;;  %s1192_s18 = smov [#allocation2]   ;;  %s1015_s12 = int_to_ptr.vmem [resolvable:$true] %s1014_s12 }
  0x42   : > { %s1021_s13 = scalar_lea.vmem %s1015_s12, 16  ;;  %s1025_s19 = scalar_lea.vmem %s1192_s18, 32 }
  0x43   : > { %p1022_p6 = scmp.ne.s32.totalorder %s1015_s12, %s1021_s13  ;;  %p1027_p10 = scmp.lt.s32.totalorder %s1025_s19, %s1021_s13 }
  0x45   : > { %p1029_p11 = pnand %p1027_p10, %p1022_p6 }
  0x47   : > { %1032 = shalt.err (!%p1029_p11)
}
  0x48   : > { %s1193_s20 = smov 320   ;;  %s1194_s11 = smov 128  }
  0x49   : > { %s1195_s4 = smov 8  }
  0x4a   : > { %267 = dma.hbm_to_vmem [thread:$0]  %s260_s27, 256, %s262_s15, %s1394_s8, %s1193_s20, %s1194_s11, %s1195_s4  }
  0x4b PF: > { %s271_s26 = sand.u32 1, %s1158_s23   ;;  %s722_s6 = smul.u32 10, %s1186_s30 }
  0x4c   : > { %s811_s14 = sshll.u32 %s271_s26, 3  ;;  %s272_s27 = scalar_lea.sflag [#allocation6], %s271_s26 }
  0x4d   : > { %s723_s21 = sadd.s32 %s1332_s16, %s722_s6  ;;  %s275_s12 = scalar_lea.vmem [#allocation5], %s811_s14 }
  0x4e   : > { %s813_s28 = sshll.u32 %s723_s21, 2  ;;  %s286_s13 = sshll.u32 %s275_s12, 4  ;;  %s287_s13 = int_to_ptr.vmem [resolvable:$true] %s286_s13 }
  0x4f   : > { %s725_s0 = scalar_lea.hbm %s1570_s1, %s813_s28  ;;  %s1196_s8 = smov 320  }
  0x50   : > { %s726_s24 = scalar_lea.hbm %s725_s0, 8  ;;  %s1197_s15 = smov 64  }
  0x51   : > { %s284_s29 = sshll.u32 %s726_s24, 4  ;;  %s1198_s20 = smov 4   ;;  %s285_s29 = int_to_ptr.hbm [resolvable:$true] %s284_s29 }
  0x52   : > { %877 = dma.hbm_to_vmem [thread:$0]  (%p1364_p13), %s285_s29, 128, %s287_s13, %s272_s27, %s1196_s8, %s1197_s15, %s1198_s20  }
  0x53 PF: > { %p814_p12 = scmp.ge.s32.totalorder %s1190_s7, 1  ;;  %p294_p8 = scmp.lt.s32.totalorder %s1190_s7, 5 }
  0x55   : > { %p295_p2 = pnand %p814_p12, %p294_p8 }
  0x56   : > { %s1423_s16 = sand.u32 (!%p295_p2), 1, %s1166_s25  }
  0x57   : > { %298 = sbr.rel (%p295_p2) target bundleno = 574 (0x23e), region = 44  ;;  %s815_s0 = sshll.u32 (!%p295_p2), %s1423_s16, 4 }
  0x58   : > { %s301_s24 = scalar_lea.sflag (!%p295_p2), [#allocation3], %s1423_s16  ;;  %s304_s11 = scalar_lea.vmem (!%p295_p2), [#allocation2], %s815_s0 }
  0x5c   : > { %1135 = dma.done.wait (%p1341_p7), %s301_s24, 256  }
  0x5d   : > { %1137 = vsyncadd (%p1341_p7), %s301_s24, 4294967040  ;;  %s310_s10 = sand.u32 1, %s1154_s22  }
  0x5e   : > { %s816_s29 = sshll.u32 %s310_s10, 3  ;;  %s311_s4 = scalar_lea.sflag [#allocation6], %s310_s10 }
  0x5f   : > { %s314_s26 = scalar_lea.vmem [#allocation5], %s816_s29 }
  0x60   : > { %1139 = dma.done.wait (%p1370_p0), %s311_s4, 128  }
  0x61   : > { %1141 = vsyncadd (%p1370_p0), %s311_s4, 4294967168  ;;  %v868_v0 = vld [vmem:[%s304_s11 + $0x4] sm:$0xf]  ;;  %v822_v1 = vld [vmem:[%s304_s11 + $0x8] sm:$0xf0]  ;;  %s1199_s6 = smov 108  }
  0x62   : > { %v1436_v2 = vor.u32 %v868_v0, %v822_v1  ;;  %s1200_s17 = smov 92   ;;  %s1201_s14 = smov 91   ;;  %v870_v3 = vld [vmem:[%s314_s26] sm:$0xff]  ;;  %v869_v5 = vld [vmem:[%s304_s11 + $0x4] sm:$0xf0]  ;;  %vm449_vm0 = vcmask 744448  }
  0x63   : > { %v820_v4 = vld [vmem:[%s304_s11] sm:$0xf]  ;;  %s1202_s9 = smov 109   ;;  %s1203_s21 = smov 110   ;;  %vm438_vm1 = vcmask 752640   ;;  %vm427_vm2 = vcmask 883712  }
  0x64   : > { %423 = vrot.lane.b32.xlu2 %v1436_v2, %s1199_s6  ;;  %434 = vrot.lane.b32.xlu1 %v1436_v2, %s1200_s17  ;;  %v1441_v6 = vor.u32 %v869_v5, %v820_v4  ;;  %s1204_s28 = smov 126   ;;  %s1205_s12 = smov 127   ;;  %vm416_vm3 = vcmask 891904   ;;  %vm405_vm4 = vcmask 900096   ;;  %vm394_vm5 = vcmask 1031168   ;;  %v470_v34 = vld [vmem:[%s1572_s3 + $0x8] sm:$0xff] }
  0x65   : > { %445 = vrot.lane.b32.xlu0 %v1436_v2, %s1201_s14  ;;  %s1206_s13 = smov 90   ;;  %v469_v35 = vld [vmem:[%s1572_s3] sm:$0xff]  ;;  %vm383_vm6 = vcmask 1039360   ;;  %v1207_v36 = vmov 0   ;;  %v872_v41 = vld [vmem:[%s1571_s2 + $0x4] sm:$0xf0] }
  0x66   : > { %993 = vset.pattern.permute.xlu1 %v1207_v36  ;;  %992 = vset.pattern.permute.xlu0 %v1207_v36  ;;  %v832_v40 = vld [vmem:[%s1571_s2] sm:$0xf]  ;;  %v472_v42 = vld [vmem:[%s1572_s3 + $0x18] sm:$0xff]  ;;  %v603_v43 = vld [vmem:[%s1574_s5 + $0x8] sm:$0xff]  ;;  %vm460_vm7 = vcmask 736256   ;;  %vm511_vm8 = vcmask 130048  }
  0x67   : > { %994 = vset.pattern.permute.xlu2 %v1207_v36  ;;  %v833_v44 = vor.u32 %v872_v41, %v832_v40  ;;  %v871_v46 = vld [vmem:[%s1571_s2 + $0x4] sm:$0xf]  ;;  %v834_v47 = vld [vmem:[%s1571_s2 + $0x8] sm:$0xf0]  ;;  %v840_v57 = vld [vmem:[%s1571_s2 + $0x10] sm:$0xf] }
  0x68   : > { %v837_v51 = vor.u32 %v871_v46, %v834_v47  ;;  %v874_v58 = vld [vmem:[%s1571_s2 + $0x14] sm:$0xf0]  ;;  %v873_v61 = vld [vmem:[%s1571_s2 + $0x14] sm:$0xf]  ;;  %v842_v62 = vld [vmem:[%s1571_s2 + $0x18] sm:$0xf0] }
  0x69   : > { %v841_v60 = vor.u32 %v874_v58, %v840_v57  ;;  %v845_v63 = vor.u32 %v873_v61, %v842_v62  ;;  %s1610_s10 = sld [smem:[#allocation23_spill]]  ;;  %s817_s26 = sshll.u32 %s1423_s16, 5 }
  0x6a   : > { %s1611_s29 = sld [smem:[#allocation13_spill]]  ;;  %s663_s15 = scalar_lea.sflag [#allocation4], %s1423_s16 }
  0x6b   : > { %s1612_s4 = sld [smem:[#allocation14_spill]] }
  0x6c   : > { %425 = vrot.lane.b32.xlu2 %v870_v3, %s1199_s6  ;;  %436 = vrot.lane.b32.xlu1 %v870_v3, %s1200_s17 }
  0x6d   : > { %447 = vrot.lane.b32.xlu0 %v870_v3, %s1201_s14 }
  0x74   : > { %443 = vrot.lane.b32.xlu2 %v1441_v6, %s1201_s14  ;;  %414 = vrot.lane.b32.xlu1 %v870_v3, %s1202_s9  ;;  %s348_s14 = scalar_lea.vmem [#allocation7], %s817_s26 }
  0x75   : > { %412 = vrot.lane.b32.xlu0 %v1436_v2, %s1202_s9  ;;  %s677_s27 = sshll.u32 %s348_s14, 4  ;;  %s678_s27 = int_to_ptr.vmem [resolvable:$true] %s677_s27 }
  0x7c   : > { %432 = vrot.lane.b32.xlu2 %v1441_v6, %s1200_s17  ;;  %403 = vrot.lane.b32.xlu1 %v870_v3, %s1203_s21  ;;  %s858_s17 = sshll.u32 %s1612_s4, 3 }
  0x7d   : > { %401 = vrot.lane.b32.xlu0 %v1436_v2, %s1203_s21 }
  0x84   : > { %421 = vrot.lane.b32.xlu2 %v1441_v6, %s1199_s6  ;;  %392 = vrot.lane.b32.xlu1 %v870_v3, %s1204_s28  ;;  %s857_s6 = sshll.u32 %s1611_s29, 1 }
  0x85   : > { %390 = vrot.lane.b32.xlu0 %v1436_v2, %s1204_s28 }
  0x8c   : > { %410 = vrot.lane.b32.xlu2 %v1441_v6, %s1202_s9  ;;  %381 = vrot.lane.b32.xlu1 %v870_v3, %s1205_s12  ;;  %s674_s9 = sadd.s32 %s858_s17, %s857_s6 }
  0x8d   : > { %379 = vrot.lane.b32.xlu0 %v1436_v2, %s1205_s12 }
  0x94   : > { %456 = vrot.lane.b32.xlu1 %v1436_v2, %s1206_s13  ;;  %458 = vrot.lane.b32.xlu2 %v870_v3, %s1206_s13 }
  0x95   : > { %399 = vrot.lane.b32.xlu0 %v1441_v6, %s1203_s21  ;;  %s859_s21 = sshll.u32 %s674_s9, 3 }
  0x9c   : > { %377 = vrot.lane.b32.xlu1 %v1441_v6, %s1205_s12  ;;  %454 = vrot.lane.b32.xlu2 %v1441_v6, %s1206_s13  ;;  %s1613_s13 = sld [smem:[#allocation24_spill]] }
  0x9d   : > { %388 = vrot.lane.b32.xlu0 %v1441_v6, %s1204_s28 }
  0xa2   : > { %s676_s18 = scalar_lea.hbm %s1613_s13, %s859_s21 }
  0xa3   : > { %s679_s8 = sshll.u32 %s676_s18, 4  ;;  %s680_s8 = int_to_ptr.hbm [resolvable:$true] %s679_s8 }
  0xa4   : > { %480 = vperm.xlu1 %993, %v470_v34   ;;  %s1076_s20 = sshra.s32 %s680_s8, 4  ;;  %s1077_s20 = int_to_ptr.hbm [resolvable:$true] %s1076_s20 }
  0xa5   : > { %475 = vperm.xlu0 %992, %v469_v35   ;;  %s1078_s0 = scalar_lea.hbm %s1077_s20, 32  ;;  %p1083_p1 = scmp.lt.s32.totalorder %s1077_s20, %s1613_s13 }
  0xa6   : > { %p1079_p7 = scmp.ne.s32.totalorder %s1077_s20, %s1078_s0 }
  0xa8   : > { %p1080_p13 = pnand %p1079_p7, %p1377_p4 }
  0xaa   : > { %p1081_p0 = pneg %p1080_p13 }
  0xac   : > { %490 = vperm.xlu1 %993, %v472_v42  }
  0xad   : > { %611 = vperm.xlu0 %992, %v603_v43  }
  0xbe   : > { %v424_v7 = vpop.permute.xlu2 %423 }
  0xc6   : > { %v426_v8 = vpop.permute.xlu2 %425 }
  0xc7   : > { %v429_v25 = vsel %vm427_vm2, %v424_v7, %v426_v8 }
  0xce   : > { %v444_v9 = vpop.permute.xlu2 %443 }
  0xd6   : > { %v433_v10 = vpop.permute.xlu2 %432  ;;  %v435_v11 = vpop.permute.xlu1 %434 }
  0xd7   : > { %v446_v12 = vpop.permute.xlu0 %445  ;;  %v439_v14 = vsel %vm438_vm1, %v433_v10, %v435_v11 }
  0xd8   : > { %v450_v13 = vsel %vm449_vm0, %v444_v9, %v446_v12 }
  0xd9   : > { %518 = vmatpush.bf16.msra.mxu0 %v450_v13 }
  0xdd   : > { %519 = vmatpush.bf16.msra.mxu0 %v439_v14 }
  0xde   : > { %v422_v15 = vpop.permute.xlu2 %421  ;;  %v437_v16 = vpop.permute.xlu1 %436 }
  0xdf   : > { %v448_v17 = vpop.permute.xlu0 %447  ;;  %v428_v18 = vsel %vm427_vm2, %v422_v15, %v424_v7  ;;  %v440_v20 = vsel %vm438_vm1, %v435_v11, %v437_v16  ;;  %v471_v7 = vld [vmem:[%s1572_s3 + $0x10] sm:$0xff]  ;;  %v602_v15 = vld [vmem:[%s1574_s5] sm:$0xff] }
  0xe0   : > { %v451_v19 = vsel %vm449_vm0, %v446_v12, %v448_v17  ;;  %485 = vperm.xlu2 %994, %v471_v7   ;;  %v875_v17 = vld [vmem:[%s1610_s10] sm:$0xff]  ;;  %s1082_s10 = scalar_lea.hbm %s1613_s13, 128 }
  0xe1   : > { %520 = vmatpush.bf16.msra.mxu0 %v428_v18  ;;  %556 = vmatpush.bf16.msra.mxu2 %v451_v19  ;;  %p1084_p3 = scmp.lt.s32.totalorder %s1082_s10, %s1078_s0 }
  0xe3   : > { %p1085_p5 = por %p1084_p3, %p1083_p1 }
  0xe5   : > { %557 = vmatpush.bf16.msra.mxu2 %v440_v20  ;;  %p1086_p6 = pnand %p1085_p5, %p1081_p0 }
  0xe6   : > { %v411_v21 = vpop.permute.xlu2 %410  ;;  %v415_v22 = vpop.permute.xlu1 %414 }
  0xe7   : > { %v413_v23 = vpop.permute.xlu0 %412 }
  0xe8   : > { %v417_v24 = vsel %vm416_vm3, %v411_v21, %v413_v23  ;;  %v418_v26 = vsel %vm416_vm3, %v413_v23, %v415_v22  ;;  %606 = vperm.xlu2 %994, %v602_v15  }
  0xe9   : > { %521 = vmatpush.bf16.msra.mxu0 %v417_v24  ;;  %558 = vmatpush.bf16.msra.mxu2 %v429_v25 }
  0xed   : > { %559 = vmatpush.bf16.msra.mxu2 %v418_v26 }
  0xee   : > { %v404_v27 = vpop.permute.xlu1 %403  ;;  %v459_v33 = vpop.permute.xlu2 %458 }
  0xef   : > { %v402_v28 = vpop.permute.xlu0 %401 }
  0xf0   : > { %v407_v29 = vsel %vm405_vm4, %v402_v28, %v404_v27 }
  0xf1   : > { %560 = vmatpush.bf16.msra.mxu2 %v407_v29 }
  0xf6   : > { %v393_v30 = vpop.permute.xlu1 %392  ;;  %v455_v45 = vpop.permute.xlu2 %454 }
  0xf7   : > { %v391_v31 = vpop.permute.xlu0 %390 }
  0xf8   : > { %v396_v32 = vsel %vm394_vm5, %v391_v31, %v393_v30 }
  0xf9   : > { %561 = vmatpush.bf16.msra.mxu2 %v396_v32 }
  0xfe   : > { %v382_v37 = vpop.permute.xlu1 %381 }
  0xff   : > { %v380_v38 = vpop.permute.xlu0 %379 }
 0x100   : > { %v385_v39 = vsel %vm383_vm6, %v380_v38, %v382_v37 }
 0x101   : > { %562 = vmatpush.bf16.msra.mxu2 %v385_v39 }
 0x105   : > { %563 = vmatpush.bf16.msra.mxu2 %v1436_v2 }
 0x106   : > { %v457_v48 = vpop.permute.xlu1 %456 }
 0x107   : > { %v400_v49 = vpop.permute.xlu0 %399  ;;  %v462_v50 = vsel %vm460_vm7, %v457_v48, %v459_v33  ;;  %v461_v52 = vsel %vm460_vm7, %v455_v45, %v457_v48 }
 0x108   : > { %564 = vmatmul.bf16.vlgmr.msra.gmra.mxu2 %v833_v44  ;;  %v406_v53 = vsel %vm405_vm4, %v400_v49, %v402_v28  ;;  %582 = vmatpush.bf16.msra.mxu3 %v462_v50 }
 0x109   : > { %522 = vmatpush.bf16.msra.mxu0 %v406_v53  ;;  %544 = vmatpush.bf16.msra.mxu1 %v461_v52 }
 0x10b   : > { %848 = vmatmul.msk.bf16.vlgmr.msra.gmra.mxu3 %vm511_vm8, %v837_v51 }
 0x10c   : > { %846 = vmatmul.msk.bf16.vlgmr.msra.gmra.mxu1 %vm511_vm8, %v837_v51 }
 0x10e   : > { %v378_v56 = vpop.permute.xlu1 %377 }
 0x10f   : > { %v389_v54 = vpop.permute.xlu0 %388  ;;  %v384_v59 = vsel %vm383_vm6, %v378_v56, %v380_v38 }
 0x110   : > { %v395_v55 = vsel %vm394_vm5, %v389_v54, %v391_v31 }
 0x111   : > { %523 = vmatpush.bf16.msra.mxu0 %v395_v55 }
 0x115   : > { %524 = vmatpush.bf16.msra.mxu0 %v384_v59 }
 0x116   : > { %v481_v4 = vpop.permute.xlu1 %480 }
 0x117   : > { %v476_v2 = vpop.permute.xlu0 %475 }
 0x118   : > { %569 = vmatmul.bf16.gmra.mxu2 %v841_v60 }
 0x119   : > { %525 = vmatpush.bf16.msra.mxu0 %v1441_v6 }
 0x11b   : > { %849 = vmatmul.msk.bf16.gmra.mxu3 %vm511_vm8, %v845_v63 }
 0x11c   : > { %526 = vmatmul.bf16.vlgmr.msra.gmra.mxu0 %v833_v44  ;;  %847 = vmatmul.msk.bf16.gmra.mxu1 %vm511_vm8, %v845_v63 }
 0x11e   : > { %v491_v43 = vpop.permute.xlu1 %490 }
 0x11f   : > { %v612_v46 = vpop.permute.xlu0 %611 }
 0x12c   : > { %531 = vmatmul.bf16.gmra.mxu0 %v841_v60 }
 0x13a   : > { %v486_v29 = vpop.permute.xlu2 %485 }
 0x142   : > { %v607_v33 = vpop.permute.xlu2 %606 }
 0x189   : > { %v546_v11 = vpop.f32.mrf.mxu1 }
 0x18b   : > { %v565_v0 = vpop.f32.mrf.mxu2 }
 0x18c   : > { %v566_v3 = vadd.f32 %v565_v0, %v476_v2 }
 0x18e   : > { %v584_v1 = vpop.f32.mrf.mxu3 }
 0x18f   : > { %v585_v9 = vadd.f32 %v584_v1, %v566_v3 }
 0x191   : > { %v595_v14 = vmax.f32 %v585_v9, 0.0  ;;  %v548_v22 = vpop.f32.mrf.mxu1 }
 0x193   : > { %v567_v5 = vpop.f32.mrf.mxu2 }
 0x194   : > { %v568_v8 = vadd.f32 %v567_v5, %v481_v4 }
 0x196   : > { %v586_v6 = vpop.f32.mrf.mxu3 }
 0x197   : > { %v587_v10 = vadd.f32 %v586_v6, %v568_v8 }
 0x199   : > { %v597_v12 = vmax.f32 %v587_v10, 0.0  ;;  %v527_v13 = vpop.f32.mrf.mxu0  ;;  %v551_v28 = vpop.f32.mrf.mxu1 }
 0x19a   : > { %v528_v18 = vadd.f32 %v527_v13, %v476_v2 }
 0x19b   : > { %v601_v16 = vpack.c.bf16 %v597_v12, %v595_v14  ;;  %v570_v31 = vpop.f32.mrf.mxu2 }
 0x19c   : > { %v547_v20 = vadd.f32 %v546_v11, %v528_v18  ;;  %v571_v32 = vadd.f32 %v570_v31, %v486_v29 }
 0x19d   : > { %643 = vmatpush.bf16.msrb.mxu3 %v601_v16 }
 0x19e   : > { %v594_v24 = vmax.f32 %v547_v20, 0.0  ;;  %v589_v27 = vpop.f32.mrf.mxu3 }
 0x19f   : > { %v590_v37 = vadd.f32 %v589_v27, %v571_v32 }
 0x1a0   : > { %855 = vmatmul.msk.bf16.vlgmr.msrb.gmra.mxu3 %vm511_vm8, %v875_v17 }
 0x1a1   : > { %v529_v19 = vpop.f32.mrf.mxu0  ;;  %v553_v35 = vpop.f32.mrf.mxu1 }
 0x1a2   : > { %v530_v21 = vadd.f32 %v529_v19, %v481_v4 }
 0x1a3   : > { %v572_v40 = vpop.f32.mrf.mxu2 }
 0x1a4   : > { %v549_v23 = vadd.f32 %v548_v22, %v530_v21  ;;  %v573_v44 = vadd.f32 %v572_v40, %v491_v43 }
 0x1a6   : > { %v596_v25 = vmax.f32 %v549_v23, 0.0  ;;  %v591_v30 = vpop.f32.mrf.mxu3 }
 0x1a7   : > { %v592_v50 = vadd.f32 %v591_v30, %v573_v44 }
 0x1a8   : > { %v600_v26 = vpack.c.bf16 %v596_v25, %v594_v24 }
 0x1a9   : > { %v532_v34 = vpop.f32.mrf.mxu0 }
 0x1aa   : > { %629 = vmatpush.bf16.msrb.mxu1 %v600_v26  ;;  %v533_v41 = vadd.f32 %v532_v34, %v486_v29 }
 0x1ac   : > { %v552_v48 = vadd.f32 %v551_v28, %v533_v41 }
 0x1ad   : > { %854 = vmatmul.msk.bf16.vlgmr.msrb.gmra.mxu1 %vm511_vm8, %v875_v17 }
 0x1b1   : > { %v534_v51 = vpop.f32.mrf.mxu0 }
 0x1b2   : > { %v535_v55 = vadd.f32 %v534_v51, %v491_v43 }
 0x1b4   : > { %v554_v59 = vadd.f32 %v553_v35, %v535_v55 }
 0x223   : > { %v645_v36 = vpop.f32.mrf.mxu3 }
 0x224   : > { %v646_v38 = vadd.f32 %v645_v36, %v607_v33 }
 0x226   : > { %v651_v39 = vadd.f32 %v646_v38, %v590_v37 }
 0x228   : > { %v655_v42 = vmax.f32 %v651_v39, 0.0 }
 0x22a   : > { %v631_v45 = vpop.f32.mrf.mxu1  ;;  %659 = vst [vmem:[%s348_s14 + $0x8] sm:$0xff] %v655_v42 }
 0x22b   : > { %v647_v47 = vpop.f32.mrf.mxu3  ;;  %v632_v49 = vadd.f32 %v631_v45, %v607_v33 }
 0x22c   : > { %v648_v52 = vadd.f32 %v647_v47, %v612_v46 }
 0x22d   : > { %v650_v53 = vadd.f32 %v632_v49, %v552_v48 }
 0x22e   : > { %v653_v54 = vadd.f32 %v648_v52, %v592_v50 }
 0x22f   : > { %v654_v56 = vmax.f32 %v650_v53, 0.0 }
 0x230   : > { %v657_v57 = vmax.f32 %v653_v54, 0.0 }
 0x231   : > { %658 = vst [vmem:[%s348_s14] sm:$0xff] %v654_v56 }
 0x232   : > { %661 = vst [vmem:[%s348_s14 + $0x18] sm:$0xff] %v657_v57  ;;  %v633_v58 = vpop.f32.mrf.mxu1 }
 0x233   : > { %v634_v60 = vadd.f32 %v633_v58, %v612_v46 }
 0x235   : > { %v652_v61 = vadd.f32 %v634_v60, %v554_v59 }
 0x237   : > { %v656_v62 = vmax.f32 %v652_v61, 0.0 }
 0x239   : > { %660 = vst [vmem:[%s348_s14 + $0x10] sm:$0xff] %v656_v62 }
 0x23a   : > { %1089 = shalt.err (!%p1086_p6)
}
 0x23b   : > { %s1208_s16 = smov 256   ;;  %s1209_s26 = smov 512  }
 0x23c   : > { %s1210_s6 = smov 16  }
 0x23d   : > { %880 = dma.vmem_to_hbm [thread:$0]  (%p1377_p4), %s678_s27, 512, %s680_s8, %s663_s15, %s1208_s16, %s1209_s26, %s1210_s6  }
 0x23e PF: > { %s1615_s17 = sld [smem:[#allocation11_spill]]  ;;  %p886_p10 = scmp.ge.s32.totalorder %s1190_s7, 2 }
 0x240   : > { %p883_p11 = pnand %p886_p10, %p1386_p9 }
 0x242   : > { %p884_p12 = pneg %p883_p11 }
 0x244   : > { %s694_s9 = sand.u32 1, %s1615_s17  }
 0x245   : > { %s695_s21 = scalar_lea.sflag [#allocation4], %s694_s9 }
 0x246   : > { %1143 = dma.done.wait (%p884_p12), %s695_s21, 512  }
 0x247   : > { %1145 = vsyncadd (%p884_p12), %s695_s21, 4294966784  ;;  %s25_s7 = sadd.s32 1, %s1190_s7   ;;  %s1617_s28 = sld [smem:[#allocation19_spill]] }
 0x248   : > { %p22_p8 = scmp.ge.s32.totalorder %s25_s7, 6   ;;  %s1618_s12 = sld [smem:[#allocation12_spill]] }
 0x249   : > { %s1619_s26 = sld [smem:[#allocation18_spill]]  ;;  %s1623_s21 = smov %s1154_s22 }
 0x24a   : > { %s1620_s27 = sld [smem:[#allocation15_spill]]  ;;  %s1624_s22 = smov %s1158_s23 }
 0x24b   : > { %s1621_s29 = sld [smem:[#allocation16_spill]]  ;;  %s1626_s24 = smov %s1166_s25 }
 0x24c   : > { %s1622_s18 = sld [smem:[#allocation17_spill]] }
 0x24d   : > { %s1625_s23 = smov %s1617_s28  ;;  %s1628_s28 = smov %s1186_s30 }
 0x24e   : > { %s1627_s25 = smov %s1618_s12  ;;  %24 = sbr.rel (!%p22_p8) target bundleno = 15 (0xf), region = 102 }
 0x252   : > { %s1629_s30 = smov %s1622_s18 }
 0x253   :  { %701 = vsyncpa [#allocation3], 1 }
 0x254   :  { %703 = vsyncpa [#allocation3 + $0x1], 1 }
 0x255   :  { %704 = vsyncpa [#allocation6], 1 }
 0x256   :  { %706 = vsyncpa [#allocation6 + $0x1], 1 }
 0x257   :  { %707 = vsyncpa [#allocation4], 1 }
 0x258   :  { %709 = vsyncpa [#allocation4 + $0x1], 1 }

</bundles_post_ra>
